<compile_context>
chip_gen: v7x
topology: tpu7x:2x2x1
jax: 0.10.0
libtpu: 0.0.40
codegen_flags: <defaults>
</compile_context>

<pallas_src>
import math
import functools

import jax
import jax.numpy as jnp
from jax import lax
from jax.experimental import pallas as pl
from jax.experimental.pallas import tpu as pltpu

# TODO(synk): `dropout_p` is an undefined free variable (NameError) in the
# source module; it is pinned to a deterministic constant here.
dropout_p = 0.1


def _hash_u32(x):
    """lowbias32-style 32-bit integer mixer (uint32 -> uint32)."""
    x = x ^ (x >> 16)
    x = x * jnp.uint32(0x7FEB352D)
    x = x ^ (x >> 15)
    x = x * jnp.uint32(0x846CA68B)
    x = x ^ (x >> 16)
    return x


def _sdpa_kernel(seed_ref, q_ref, k_ref, v_ref, mask_ref, o_ref,
                 m_scr, l_scr, acc_scr, *,
                 scale, p_drop, heads, lq, lk, block_k):
    b = pl.program_id(0)          # batch index
    j = pl.program_id(1)          # kv-block index (reduction axis)
    hlq = heads * lq

    @pl.when(j == 0)
    def _():
        m_scr[...] = jnp.full(m_scr.shape, -jnp.inf, dtype=jnp.float32)
        l_scr[...] = jnp.zeros(l_scr.shape, dtype=jnp.float32)
        acc_scr[...] = jnp.zeros(acc_scr.shape, dtype=jnp.float32)

    # Fold 1/sqrt(D) into q (Lq*D mul instead of Lq*Lk mul).
    q = q_ref[0].astype(jnp.float32) * scale      # (H*Lq, D)  all heads fused
    k = k_ref[0]                                  # (block_k, D) head-shared
    v = v_ref[0]                                  # (H, block_k, Dv)
    mask = mask_ref[0].astype(jnp.float32)        # (H*Lq, 1) broadcast over keys

    # scores: contract on d for both operands (no explicit k.T / relayout)
    s = lax.dot_general(q, k, (((1,), (1,)), ((), ())),
                        preferred_element_type=jnp.float32) + mask

    # online softmax update
    m_prev = m_scr[...]
    m_new = jnp.maximum(m_prev, jnp.max(s, axis=-1, keepdims=True))
    alpha = jnp.exp(m_prev - m_new)
    e = jnp.exp(s - m_new)                        # (H*Lq, block_k) unnormalized
    l_scr[...] = alpha * l_scr[...] + jnp.sum(e, axis=-1, keepdims=True)
    m_scr[...] = m_new

    p = e
    if p_drop > 0.0:
        # Counter-based dropout: hash(global element id, seed) -> uniform [0,1).
        ri = lax.broadcasted_iota(jnp.int32, (hlq, block_k), 0)
        ci = lax.broadcasted_iota(jnp.int32, (hlq, block_k), 1) + j * block_k
        gid = (b * hlq + ri) * lk + ci
        x = gid.astype(jnp.uint32) + seed_ref[0].astype(jnp.uint32) * jnp.uint32(0x9E3779B1)
        x = _hash_u32(x)
        u = (x >> 9).astype(jnp.float32) * jnp.float32(1.0 / (1 << 23))
        p = jnp.where(u >= p_drop, e, 0.0)        # 1/(1-p) rescale folded into finalize

    # per-head PV matmul: (H, Lq, block_k) @ (H, block_k, Dv)
    pv = jnp.einsum('hqk,hkd->hqd',
                    p.reshape(heads, lq, block_k).astype(v.dtype), v,
                    preferred_element_type=jnp.float32)
    acc_scr[...] = alpha * acc_scr[...] + pv.reshape(hlq, v.shape[-1])

    @pl.when(j == pl.num_programs(1) - 1)
    def _():
        keep_scale = 1.0 / (1.0 - p_drop) if p_drop > 0.0 else 1.0
        inv = keep_scale / l_scr[...]             # softmax denom + dropout rescale
        o_ref[0] = (acc_scr[...] * inv).astype(o_ref.dtype)


def sdpa(key_t, value_t, query_t, attn_mask, seed, p_drop, *, block_k=None):
    B, H, Lq, D = query_t.shape
    Bk, Hk, Lk, Dk = key_t.shape
    Dv = value_t.shape[-1]
    assert (Bk, Dk) == (B, D)
    # The source module's key broadcasts over the head dim (H_k == 1); keep it
    # un-broadcast in HBM and reuse the same (Lk, D) block for every head.
    assert Hk == 1, "head-shared key expected (matches the source module)"
    assert value_t.shape == (B, H, Lk, Dv)
    assert attn_mask.shape == (B, H, Lq, 1)

    if block_k is None:
        block_k = Lk if Lk <= 512 else 512
    assert Lk % block_k == 0 and (block_k == Lk or block_k % 8 == 0)

    # Free reshapes only — no broadcast materialization in HBM.
    q2 = query_t.reshape(B, H * Lq, D)
    k2 = key_t.reshape(B, Lk, D)
    m2 = attn_mask.reshape(B, H * Lq, 1)

    kernel = functools.partial(
        _sdpa_kernel, scale=1.0 / math.sqrt(D), p_drop=float(p_drop),
        heads=H, lq=Lq, lk=Lk, block_k=block_k)

    out = pl.pallas_call(
        kernel,
        out_shape=jax.ShapeDtypeStruct((B, H * Lq, Dv), query_t.dtype),
        grid_spec=pltpu.PrefetchScalarGridSpec(
            num_scalar_prefetch=1,
            grid=(B, Lk // block_k),
            in_specs=[
                pl.BlockSpec((1, H * Lq, D), lambda b, j, sd: (b, 0, 0)),
                pl.BlockSpec((1, block_k, D), lambda b, j, sd: (b, j, 0)),
                pl.BlockSpec((1, H, block_k, Dv), lambda b, j, sd: (b, 0, j, 0)),
                pl.BlockSpec((1, H * Lq, 1), lambda b, j, sd: (b, 0, 0)),
            ],
            out_specs=pl.BlockSpec((1, H * Lq, Dv), lambda b, j, sd: (b, 0, 0)),
            scratch_shapes=[
                pltpu.VMEM((H * Lq, 1), jnp.float32),    # running max
                pltpu.VMEM((H * Lq, 1), jnp.float32),    # running denominator
                pltpu.VMEM((H * Lq, Dv), jnp.float32),   # output accumulator
            ],
        ),
        compiler_params=pltpu.CompilerParams(
            dimension_semantics=("parallel", "arbitrary")),
    )(seed, q2, k2, value_t, m2)
    return out.reshape(B, H, Lq, Dv)


def _reference_no_dropout(key_t, value_t, query_t, attn_mask):
    D = query_t.shape[-1]
    kb = jnp.broadcast_to(key_t, query_t.shape[:2] + key_t.shape[2:])
    qk = jnp.einsum("bhqd,bhkd->bhqk", query_t, kb) / math.sqrt(D) + attn_mask
    w = jax.nn.softmax(qk, axis=-1)
    return jnp.einsum("bhqk,bhkd->bhqd", w, value_t)


if __name__ == "__main__":
    # Small shapes consistent with the module's SDPA pattern (key head-shared,
    # mask broadcast over keys).
    B, H, Lq, Lk, D, Dv = 2, 4, 8, 16, 16, 16
    k0, k1, k2, k3 = jax.random.split(jax.random.PRNGKey(0), 4)

    query = jax.random.normal(k0, (B, H, Lq, D), dtype=jnp.float32)
    key = jax.random.normal(k1, (B, 1, Lk, D), dtype=jnp.float32)        # broadcast over heads
    value = jax.random.normal(k2, (B, H, Lk, Dv), dtype=jnp.float32)
    attn_mask = jax.random.normal(k3, (B, H, Lq, 1), dtype=jnp.float32)  # broadcast over keys
    seed = jnp.array([0], dtype=jnp.int32)

    # sanity check: kernel with dropout disabled matches a pure-JAX reference
    # (block_k=8 forces two KV steps so the online-softmax path is exercised)
    out_nodrop = sdpa(key, value, query, attn_mask, seed, 0.0, block_k=8)
    ref = _reference_no_dropout(key, value, query, attn_mask)
    assert jnp.allclose(out_nodrop, ref, atol=2e-5, rtol=2e-5), "mismatch vs reference"

    # full forward (with dropout, training=True)
    out = sdpa(key, value, query, attn_mask, seed, dropout_p, block_k=8)
    jax.block_until_ready(out)
    assert out.shape == (B, H, Lq, Dv)
    assert bool(jnp.all(jnp.isfinite(out)))
    print("KERNEL_OK")
</pallas_src>

<mosaic_0001>
module attributes {stable_mosaic.version = 11 : i64} {
  func.func @_sdpa_kernel(%arg0: i32, %arg1: i32, %arg2: memref<1xi32, #tpu.memory_space<smem>>, %arg3: memref<1x32x16xf32, #tpu.memory_space<vmem>>, %arg4: memref<1x8x16xf32, #tpu.memory_space<vmem>>, %arg5: memref<1x4x8x16xf32, #tpu.memory_space<vmem>>, %arg6: memref<1x32x1xf32, #tpu.memory_space<vmem>>, %arg7: memref<1x32x16xf32, #tpu.memory_space<vmem>>, %arg8: memref<32x1xf32, #tpu.memory_space<vmem>>, %arg9: memref<32x1xf32, #tpu.memory_space<vmem>>, %arg10: memref<32x16xf32, #tpu.memory_space<vmem>>) attributes {dimension_semantics = [#tpu.dimension_semantics<parallel>, #tpu.dimension_semantics<arbitrary>], iteration_bounds = array<i64: 2, 2>, scalar_prefetch = 1 : i64, scratch_operands = 3 : i64, tpu.core_type = #tpu.core_type<tc>, window_params = [{transform_indices = @transform_0, window_bounds = array<i64: 1, 32, 16>}, {transform_indices = @transform_1, window_bounds = array<i64: 1, 8, 16>}, {transform_indices = @transform_2, window_bounds = array<i64: 1, 4, 8, 16>}, {transform_indices = @transform_3, window_bounds = array<i64: 1, 32, 1>}, {transform_indices = @transform_4, window_bounds = array<i64: 1, 32, 16>}]} {
    %c0_i32 = arith.constant 0 : i32
    %0 = arith.cmpi eq, %arg1, %c0_i32 : i32
    %1 = arith.extui %0 : i1 to i32
    %c0_i32_0 = arith.constant 0 : i32
    %2 = arith.cmpi ne, %1, %c0_i32_0 : i32
    scf.if %2 {
      %cst_30 = arith.constant 0xFF800000 : f32
      %43 = vector.broadcast %cst_30 : f32 to vector<32x1xf32>
      %c0_31 = arith.constant 0 : index
      %c0_32 = arith.constant 0 : index
      %44 = vector.load %arg8[%c0_31, %c0_32] : memref<32x1xf32, #tpu.memory_space<vmem>>, vector<32x1xf32>
      tpu.vector_store %arg8[%c0_31, %c0_32], %43 {strides = array<i32>} : memref<32x1xf32, #tpu.memory_space<vmem>>, vector<32x1xf32>,
      %cst_33 = arith.constant 0.000000e+00 : f32
      %45 = vector.broadcast %cst_33 : f32 to vector<32x1xf32>
      %c0_34 = arith.constant 0 : index
      %c0_35 = arith.constant 0 : index
      %46 = vector.load %arg9[%c0_34, %c0_35] : memref<32x1xf32, #tpu.memory_space<vmem>>, vector<32x1xf32>
      tpu.vector_store %arg9[%c0_34, %c0_35], %45 {strides = array<i32>} : memref<32x1xf32, #tpu.memory_space<vmem>>, vector<32x1xf32>,
      %cst_36 = arith.constant 0.000000e+00 : f32
      %47 = vector.broadcast %cst_36 : f32 to vector<32x16xf32>
      %c0_37 = arith.constant 0 : index
      %c0_38 = arith.constant 0 : index
      %48 = vector.load %arg10[%c0_37, %c0_38] : memref<32x16xf32, #tpu.memory_space<vmem>>, vector<32x16xf32>
      tpu.vector_store %arg10[%c0_37, %c0_38], %47 {strides = array<i32>} : memref<32x16xf32, #tpu.memory_space<vmem>>, vector<32x16xf32>,
    } else {
    }
    %c0 = arith.constant 0 : index
    %c0_1 = arith.constant 0 : index
    %c0_2 = arith.constant 0 : index
    %3 = vector.load %arg3[%c0, %c0_1, %c0_2] : memref<1x32x16xf32, #tpu.memory_space<vmem>>, vector<1x32x16xf32>
    %4 = vector.shape_cast %3 : vector<1x32x16xf32> to vector<32x16xf32>
    %cst = arith.constant 2.500000e-01 : f32
    %5 = vector.broadcast %cst : f32 to vector<32x16xf32>
    %6 = arith.mulf %4, %5 : vector<32x16xf32>
    %c0_3 = arith.constant 0 : index
    %c0_4 = arith.constant 0 : index
    %c0_5 = arith.constant 0 : index
    %7 = vector.load %arg4[%c0_3, %c0_4, %c0_5] : memref<1x8x16xf32, #tpu.memory_space<vmem>>, vector<1x8x16xf32>
    %8 = vector.shape_cast %7 : vector<1x8x16xf32> to vector<8x16xf32>
    %c0_6 = arith.constant 0 : index
    %c0_7 = arith.constant 0 : index
    %c0_8 = arith.constant 0 : index
    %c0_9 = arith.constant 0 : index
    %9 = vector.load %arg5[%c0_6, %c0_7, %c0_8, %c0_9] : memref<1x4x8x16xf32, #tpu.memory_space<vmem>>, vector<1x4x8x16xf32>
    %10 = vector.shape_cast %9 : vector<1x4x8x16xf32> to vector<4x8x16xf32>
    %c0_10 = arith.constant 0 : index
    %c0_11 = arith.constant 0 : index
    %c0_12 = arith.constant 0 : index
    %11 = vector.load %arg6[%c0_10, %c0_11, %c0_12] : memref<1x32x1xf32, #tpu.memory_space<vmem>>, vector<1x32x1xf32>
    %12 = vector.shape_cast %11 : vector<1x32x1xf32> to vector<32x1xf32>
    %cst_13 = arith.constant dense<0.000000e+00> : vector<32x8xf32>
    %13 = tpu.matmul %6, %8, %cst_13 {dimension_numbers = #tpu.dot_dimension_numbers<[1], [1], [0], [0], [0, 0, 1, 0], [], []>} : vector<32x16xf32>, vector<8x16xf32>, vector<32x8xf32> -> vector<32x8xf32>
    %14 = vector.broadcast %12 : vector<32x1xf32> to vector<32x8xf32>
    %15 = arith.addf %13, %14 : vector<32x8xf32>
    %c0_14 = arith.constant 0 : index
    %c0_15 = arith.constant 0 : index
    %16 = vector.load %arg8[%c0_14, %c0_15] : memref<32x1xf32, #tpu.memory_space<vmem>>, vector<32x1xf32>
    %cst_16 = arith.constant dense<0xFF800000> : vector<32xf32>
    %17 = vector.multi_reduction <maximumf>, %15, %cst_16 [1] : vector<32x8xf32> to vector<32xf32>
    %18 = vector.shape_cast %17 : vector<32xf32> to vector<32x1xf32>
    %19 = arith.maximumf %16, %18 : vector<32x1xf32>
    %20 = arith.subf %16, %19 : vector<32x1xf32>
    %21 = math.exp %20 : vector<32x1xf32>
    %22 = vector.broadcast %19 : vector<32x1xf32> to vector<32x8xf32>
    %23 = arith.subf %15, %22 : vector<32x8xf32>
    %24 = math.exp %23 : vector<32x8xf32>
    %c0_17 = arith.constant 0 : index
    %c0_18 = arith.constant 0 : index
    %25 = vector.load %arg9[%c0_17, %c0_18] : memref<32x1xf32, #tpu.memory_space<vmem>>, vector<32x1xf32>
    %26 = arith.mulf %21, %25 : vector<32x1xf32>
    %cst_19 = arith.constant dense<0.000000e+00> : vector<32xf32>
    %27 = vector.multi_reduction <add>, %24, %cst_19 [1] : vector<32x8xf32> to vector<32xf32>
    %28 = vector.shape_cast %27 : vector<32xf32> to vector<32x1xf32>
    %29 = arith.addf %26, %28 : vector<32x1xf32>
    %c0_20 = arith.constant 0 : index
    %c0_21 = arith.constant 0 : index
    %30 = vector.load %arg9[%c0_20, %c0_21] : memref<32x1xf32, #tpu.memory_space<vmem>>, vector<32x1xf32>
    tpu.vector_store %arg9[%c0_20, %c0_21], %29 {strides = array<i32>} : memref<32x1xf32, #tpu.memory_space<vmem>>, vector<32x1xf32>,
    %c0_22 = arith.constant 0 : index
    %c0_23 = arith.constant 0 : index
    %31 = vector.load %arg8[%c0_22, %c0_23] : memref<32x1xf32, #tpu.memory_space<vmem>>, vector<32x1xf32>
    tpu.vector_store %arg8[%c0_22, %c0_23], %19 {strides = array<i32>} : memref<32x1xf32, #tpu.memory_space<vmem>>, vector<32x1xf32>,
    %32 = vector.shape_cast %24 : vector<32x8xf32> to vector<4x8x8xf32>
    "tpu.trace_start"() <{level = 10 : i32, message = "hqk,hkd->hqd"}> : () -> ()
    %cst_24 = arith.constant dense<0.000000e+00> : vector<4x8x16xf32>
    %33 = tpu.matmul %32, %10, %cst_24 {dimension_numbers = #tpu.dot_dimension_numbers<[2], [1], [1], [2], [0, 0, 0, 1, 1, 2], [0], [0]>} : vector<4x8x8xf32>, vector<4x8x16xf32>, vector<4x8x16xf32> -> vector<4x8x16xf32>
    "tpu.trace_stop"() : () -> ()
    %c0_25 = arith.constant 0 : index
    %c0_26 = arith.constant 0 : index
    %34 = vector.load %arg10[%c0_25, %c0_26] : memref<32x16xf32, #tpu.memory_space<vmem>>, vector<32x16xf32>
    %35 = vector.broadcast %21 : vector<32x1xf32> to vector<32x16xf32>
    %36 = arith.mulf %35, %34 : vector<32x16xf32>
    %37 = vector.shape_cast %33 : vector<4x8x16xf32> to vector<32x16xf32>
    %38 = arith.addf %36, %37 : vector<32x16xf32>
    %c0_27 = arith.constant 0 : index
    %c0_28 = arith.constant 0 : index
    %39 = vector.load %arg10[%c0_27, %c0_28] : memref<32x16xf32, #tpu.memory_space<vmem>>, vector<32x16xf32>
    tpu.vector_store %arg10[%c0_27, %c0_28], %38 {strides = array<i32>} : memref<32x16xf32, #tpu.memory_space<vmem>>, vector<32x16xf32>,
    %c1_i32 = arith.constant 1 : i32
    %40 = arith.cmpi eq, %arg1, %c1_i32 : i32
    %41 = arith.extui %40 : i1 to i32
    %c0_i32_29 = arith.constant 0 : i32
    %42 = arith.cmpi ne, %41, %c0_i32_29 : i32
    scf.if %42 {
      %c0_30 = arith.constant 0 : index
      %c0_31 = arith.constant 0 : index
      %43 = vector.load %arg9[%c0_30, %c0_31] : memref<32x1xf32, #tpu.memory_space<vmem>>, vector<32x1xf32>
      %cst_32 = arith.constant 1.000000e+00 : f32
      %44 = vector.broadcast %cst_32 : f32 to vector<32x1xf32>
      %45 = arith.divf %44, %43 : vector<32x1xf32>
      %c0_33 = arith.constant 0 : index
      %c0_34 = arith.constant 0 : index
      %46 = vector.load %arg10[%c0_33, %c0_34] : memref<32x16xf32, #tpu.memory_space<vmem>>, vector<32x16xf32>
      %47 = vector.broadcast %45 : vector<32x1xf32> to vector<32x16xf32>
      %48 = arith.mulf %46, %47 : vector<32x16xf32>
      %c0_35 = arith.constant 0 : index
      %c0_36 = arith.constant 0 : index
      %c0_37 = arith.constant 0 : index
      %49 = vector.load %arg7[%c0_35, %c0_36, %c0_37] : memref<1x32x16xf32, #tpu.memory_space<vmem>>, vector<1x32x16xf32>
      %50 = vector.shape_cast %49 : vector<1x32x16xf32> to vector<32x16xf32>
      %51 = vector.shape_cast %48 : vector<32x16xf32> to vector<1x32x16xf32>
      tpu.vector_store %arg7[%c0_35, %c0_36, %c0_37], %51 {strides = array<i32>} : memref<1x32x16xf32, #tpu.memory_space<vmem>>, vector<1x32x16xf32>,
    } else {
    }
    return
  }
  func.func @transform_0(%arg0: i32, %arg1: i32, %arg2: memref<1xi32, #tpu.memory_space<smem>>) -> (i32, i32, i32) {
    %c0_i32 = arith.constant 0 : i32
    %c0_i32_0 = arith.constant 0 : i32
    %c0_i32_1 = arith.constant 0 : i32
    return %arg0, %c0_i32, %c0_i32_0 : i32, i32, i32
  }
  func.func @transform_1(%arg0: i32, %arg1: i32, %arg2: memref<1xi32, #tpu.memory_space<smem>>) -> (i32, i32, i32) {
    %c0_i32 = arith.constant 0 : i32
    %c0_i32_0 = arith.constant 0 : i32
    return %arg0, %arg1, %c0_i32 : i32, i32, i32
  }
  func.func @transform_2(%arg0: i32, %arg1: i32, %arg2: memref<1xi32, #tpu.memory_space<smem>>) -> (i32, i32, i32, i32) {
    %c0_i32 = arith.constant 0 : i32
    %c0_i32_0 = arith.constant 0 : i32
    %c0_i32_1 = arith.constant 0 : i32
    return %arg0, %c0_i32, %arg1, %c0_i32_0 : i32, i32, i32, i32
  }
  func.func @transform_3(%arg0: i32, %arg1: i32, %arg2: memref<1xi32, #tpu.memory_space<smem>>) -> (i32, i32, i32) {
    %c0_i32 = arith.constant 0 : i32
    %c0_i32_0 = arith.constant 0 : i32
    %c0_i32_1 = arith.constant 0 : i32
    return %arg0, %c0_i32, %c0_i32_0 : i32, i32, i32
  }
  func.func @transform_4(%arg0: i32, %arg1: i32, %arg2: memref<1xi32, #tpu.memory_space<smem>>) -> (i32, i32, i32) {
    %c0_i32 = arith.constant 0 : i32
    %c0_i32_0 = arith.constant 0 : i32
    %c0_i32_1 = arith.constant 0 : i32
    return %arg0, %c0_i32, %c0_i32_0 : i32, i32, i32
  }
}

</mosaic_0001>

<bundles_post_ra>
// kernel: tpu_custom_call.1
= control target key start
LH: loop header
LB: loop body
LE: loop exit
PB: predicated region body
PF: predicated region fallthrough
CT: control target
= control target key end

     0   :  { %s1515_s0 = inlined_call_operand.<no memory space> [shape: s32[1], index: 0, kind: input, shape index: {}]   ;;  %s1516_s1 = inlined_call_operand.vmem [shape: f32[2,32,16], index: 1, kind: input, shape index: {}]   ;;  %s1517_s2 = inlined_call_operand.vmem [shape: f32[2,16,16], index: 2, kind: input, shape index: {}]   ;;  %s1518_s3 = inlined_call_operand.vmem [shape: f32[2,4,16,16], index: 3, kind: input, shape index: {}]   ;;  %s1519_s4 = inlined_call_operand.vmem [shape: f32[2,32,1], index: 4, kind: input, shape index: {}]   ;;  %s1520_s5 = inlined_call_operand.vmem [shape: f32[2,32,16], index: 5, kind: output, shape index: {}]  }
   0x1   :  { %1521 = sst [smem:[#allocation8_spill]] %s1518_s3 }
   0x2   :  { %s1335_s18 = smov 0   ;;  %s1337_s19 = smov 0  }
   0x3   :  { %s1339_s0 = smov 0   ;;  %s1341_s20 = smov 0  }
   0x4   :  { %s1343_s21 = smov 0   ;;  %s1345_s22 = smov 0  }
   0x5   :  { %s1347_s23 = smov 0  }
   0x6 LB: > { %s25_s24 = sadd.s32 1, %s1289_s21  ;;  %s28_s25 = sadd.s32 1, %s1293_s22  ;;  %s1297_s23 = sphi %s1347_s23, %s16_s23   ;;  %s1293_s22 = sphi %s1345_s22, %s1528_s22   ;;  %s1289_s21 = sphi %s1343_s21, %s1527_s21   ;;  %s1285_s20 = sphi %s1341_s20, %s1526_s20   ;;  %s1281_s0 = sphi %s1339_s0, %s1525_s0   ;;  %s1277_s19 = sphi %s1337_s19, %s1524_s19   ;;  %s1273_s18 = sphi %s1335_s18, %s1523_s18  }
   0x7   : > { %p26_p0 = scmp.ge.s32.totalorder %s25_s24, 2  ;;  %p98_p1 = scmp.ne.s32.totalorder %s1277_s19, %s1273_s18 }
   0x8   : > { %p99_p2 = scmp.eq.s32.totalorder %s1297_s23, 0  ;;  %s91_s29 = sadd.s32 1, %s1277_s19 }
   0x9   : > { %s1530_s24 = smov (%p26_p0, %s25_s24), 0  ;;  %s1532_s25 = smov (!%p26_p0, %s28_s25), %s1293_s22 }
   0xa   : > { %p100_p3 = por %p99_p2, %p98_p1  ;;  %p30_p4 = scmp.ge.s32.totalorder %s1532_s25, 2 }
   0xb   : > { %s87_s26 = ssub.s32 %s1289_s21, %s1530_s24  ;;  %p1082_p6 = scmp.ge.s32.totalorder %s1297_s23, 4 }
   0xc   : > { %s1534_s25 = smov (%p30_p4, %s1532_s25), 0 }
   0xd   : > { %s86_s27 = ssub.s32 %s1293_s22, %s1534_s25  ;;  %176 = sbr.rel (%p1082_p6) target bundleno = 32 (0x20), region = 16 }
   0xe   : > { %s88_s28 = sor.u32 %s87_s26, %s86_s27 }
   0xf   : > { %p89_p5 = scmp.eq.s32.totalorder %s88_s28, 0 }
  0x11   : > { %s1386_s30 = scalar_select %p89_p5, %s1277_s19, %s91_s29  }
  0x14   : > { %198 = sbr.rel (!%p100_p3) target bundleno = 32 (0x20), region = 28  ;;  %s200_s6 = sand.u32 (%p100_p3), 1, %s1277_s19  }
  0x15   : > { %s1084_s7 = sshll.u32 (%p100_p3), %s1293_s22, 3  ;;  %s1083_s8 = sshll.u32 (%p100_p3), %s200_s6, 5 }
  0x16   : > { %s204_s9 = sadd.s32 (%p100_p3), %s1289_s21, %s1084_s7  ;;  %s1522_s3 = sld [smem:[#allocation8_spill]] (%p100_p3) }
  0x17   : > { %s1085_s10 = sshll.u32 (%p100_p3), %s204_s9, 3  ;;  %s202_s14 = scalar_lea.vmem (%p100_p3), [#allocation7], %s1083_s8 }
  0x1c   : > { %s206_s13 = scalar_lea.vmem %s1522_s3, %s1085_s10 }
  0x1d   : > { %v240_v0 = vld [vmem:[%s206_s13] sm:$0xff]  ;;  %v242_v1 = vld [vmem:[%s206_s13 + $0x10] sm:$0xff] }
  0x1e   : > { %v244_v2 = vld [vmem:[%s206_s13 + $0x20] sm:$0xff]  ;;  %241 = vst [vmem:[%s202_s14] sm:$0xff] %v240_v0  ;;  %243 = vst [vmem:[%s202_s14 + $0x8] sm:$0xff] %v242_v1  ;;  %v246_v3 = vld [vmem:[%s206_s13 + $0x30] sm:$0xff] }
  0x1f   : > { %245 = vst [vmem:[%s202_s14 + $0x10] sm:$0xff] %v244_v2  ;;  %247 = vst [vmem:[%s202_s14 + $0x18] sm:$0xff] %v246_v3 }
  0x20 PF: > { %p1086_p7 = scmp.ge.s32.totalorder %s1297_s23, 1  ;;  %p260_p8 = scmp.lt.s32.totalorder %s1297_s23, 5 }
  0x22   : > { %p261_p9 = pnand %p1086_p7, %p260_p8 }
  0x23   : > { %s267_s15 = sand.u32 (!%p261_p9), 1, %s1273_s18   ;;  %p310_p10 = scmp.lt.s32.totalorder (!%p261_p9), %s1285_s20, 1 }
  0x24   : > { %264 = sbr.rel (%p261_p9) target bundleno = 872 (0x368), region = 70  ;;  %s1087_s16 = sshll.u32 (!%p261_p9), %s267_s15, 5 }
  0x25   : > { %p317_p11 = scmp.lt.s32.totalorder (!%p261_p9), %s1281_s0, 1  ;;  %s1420_s3 = scalar_lea.vmem (!%p261_p9), [#allocation7], %s1087_s16 }
  0x26   : > { %p1096_p12 = scmp.ne.s32.totalorder (!%p261_p9), %s1281_s0, 0 }
  0x2b   : > { %s1536_s20 = smov (!%p310_p10, %s1285_s20), 1  ;;  %336 = sbr.rel (%p1096_p12) target bundleno = 52 (0x34), region = 78 }
  0x2c   : > { %s318_s17 = scalar_select %p317_p11, %s1281_s0, 1 }
  0x2d   : > { %s1109_s26 = sshll.u32 %s1536_s20, 5  ;;  %s1090_s27 = sshll.u32 %s1536_s20, 1  ;;  %vm337_vm0 = vcmask (!%p1096_p12), 7168   ;;  %vm346_vm1 = vcmask (!%p1096_p12), 130048   ;;  %v1299_v4 = vmov (!%p1096_p12), -inf   ;;  %v1300_v5 = vmov (!%p1096_p12), 0.0  }
  0x2e   : > { %s1405_s6 = scalar_lea.vmem %s1516_s1, %s1109_s26  ;;  %s320_s7 = sadd.s32 %s1090_s27, %s318_s17  ;;  %338 = vst.msk [vmem:[#allocation2] sm:$0xff] (!%p1096_p12), %vm337_vm0, %v1299_v4  ;;  %339 = vst.msk [vmem:[#allocation2 + $0x8] sm:$0xff] (!%p1096_p12), %vm337_vm0, %v1299_v4 }
  0x2f   : > { %s1091_s8 = sshll.u32 %s320_s7, 3  ;;  %s1410_s11 = scalar_lea.vmem %s1519_s4, %s1109_s26  ;;  %340 = vst.msk [vmem:[#allocation2 + $0x10] sm:$0xff] (!%p1096_p12), %vm337_vm0, %v1299_v4  ;;  %341 = vst.msk [vmem:[#allocation2 + $0x18] sm:$0xff] (!%p1096_p12), %vm337_vm0, %v1299_v4 }
  0x30   : > { %s322_s13 = scalar_lea.vmem %s1517_s2, %s1091_s8  ;;  %s1418_s20 = scalar_lea.vmem %s1520_s5, %s1109_s26  ;;  %342 = vst.msk [vmem:[#allocation3] sm:$0xff] (!%p1096_p12), %vm337_vm0, %v1300_v5  ;;  %343 = vst.msk [vmem:[#allocation3 + $0x8] sm:$0xff] (!%p1096_p12), %vm337_vm0, %v1300_v5 }
  0x31   : > { %344 = vst.msk [vmem:[#allocation3 + $0x10] sm:$0xff] (!%p1096_p12), %vm337_vm0, %v1300_v5  ;;  %345 = vst.msk [vmem:[#allocation3 + $0x18] sm:$0xff] (!%p1096_p12), %vm337_vm0, %v1300_v5 }
  0x32   : > { %347 = vst.msk [vmem:[#allocation4] sm:$0xff] %vm346_vm1, %v1300_v5  ;;  %348 = vst.msk [vmem:[#allocation4 + $0x8] sm:$0xff] %vm346_vm1, %v1300_v5 }
  0x33   : > { %349 = vst.msk [vmem:[#allocation4 + $0x10] sm:$0xff] %vm346_vm1, %v1300_v5  ;;  %350 = vst.msk [vmem:[#allocation4 + $0x18] sm:$0xff] %vm346_vm1, %v1300_v5 }
  0x34 PF: > { %v359_v6 = vld [vmem:[%s322_s13] sm:$0xff]  ;;  %vm388_vm2 = vcmask 130048   ;;  %v352_v8 = vld [vmem:[%s1405_s6 + $0x8] sm:$0xff]  ;;  %v353_v11 = vld [vmem:[%s1405_s6 + $0x10] sm:$0xff]  ;;  %v1301_v12 = vmov 0   ;;  %vm493_vm3 = vcmask 64512  }
  0x35   : > { %v351_v7 = vld [vmem:[%s1405_s6] sm:$0xff]  ;;  %1125 = vmatprep.subr.msk.mxu0 %vm388_vm2, %v359_v6  ;;  %v356_v10 = vmul.f32 0.25, %v352_v8  ;;  %1215 = vset.pattern.permute.xlu0 %v1301_v12  ;;  %v357_v14 = vmul.f32 0.25, %v353_v11  ;;  %v354_v15 = vld [vmem:[%s1405_s6 + $0x18] sm:$0xff]  ;;  %v366_v16 = vld [vmem:[%s1410_s11 + $0x10] sm:$0xff]  ;;  %vm578_vm4 = vcmask 7168  }
  0x36   : > { %v355_v9 = vmul.f32 0.25, %v351_v7  ;;  %v364_v13 = vld [vmem:[%s1410_s11] sm:$0xff]  ;;  %1126 = vmatpush3.xpose.msk.msra.mxu0 %vm388_vm2, %v359_v6  ;;  %1216 = vset.pattern.permute.xlu1 %v1301_v12  ;;  %v365_v17 = vld [vmem:[%s1410_s11 + $0x8] sm:$0xff]  ;;  %v358_v18 = vmul.f32 0.25, %v354_v15  ;;  %v367_v19 = vld [vmem:[%s1410_s11 + $0x18] sm:$0xff]  ;;  %v1302_v54 = vmov 0.0  }
  0x37   : > { %370 = vperm.xlu0 %1215, %v364_v13   ;;  %380 = vperm.xlu1 %1216, %v366_v16   ;;  %v1441_v36 = vld [vmem:[#allocation2 + $0x8] sm:$0xff]  ;;  %v489_v37 = vld [vmem:[#allocation2] sm:$0xff]  ;;  %vm1303_vm5 = vmmov 0   ;;  %v363_v56 = vld [vmem:[%s1420_s3 + $0x18] sm:$0xff]  ;;  %p1106_p13 = scmp.ne.s32.totalorder %s1281_s0, 1 }
  0x38   : > { %1127 = vmatprep.mubr.msk.f32.mxu0 %vm388_vm2, %v355_v9  ;;  %v491_v43 = vld [vmem:[#allocation2 + $0x10] sm:$0xff]  ;;  %v492_v48 = vld [vmem:[#allocation2 + $0x18] sm:$0xff]  ;;  %v360_v53 = vld [vmem:[%s1420_s3] sm:$0xff]  ;;  %1133 = vmatprep.subr.mxu1 %v1302_v54 }
  0x39   : > { %1128 = vmatmul.mubr.msk.f32.vlgmr.msra.gmra.mrb[0].mxu0 %vm388_vm2, %v356_v10  ;;  %1135 = vmatprep.mubr.msk.f32.mxu1 %vm1303_vm5, %v1302_v54  ;;  %v361_v6 = vld [vmem:[%s1420_s3 + $0x8] sm:$0xff]  ;;  %v362_v11 = vld [vmem:[%s1420_s3 + $0x10] sm:$0xff] }
  0x3a   : > { %1130 = vmatprep.mubr.msk.f32.mxu0 %vm388_vm2, %v357_v14  ;;  %1134 = vmatpush3.msra.mxu1 %v360_v53 }
  0x3b   : > { %375 = vperm.xlu0 %1215, %v365_v17   ;;  %385 = vperm.xlu1 %1216, %v367_v19  }
  0x3c   : > { %1148 = vmatprep.subr.mxu0 %v1302_v54  ;;  %1138 = vmatprep.subr.mxu1 %v1302_v54 }
  0x3d   : > { %1131 = vmatmul.mubr.msk.f32.gmra.mrb[2].mxu0 %vm388_vm2, %v358_v18 }
  0x3e   : > { %1150 = vmatprep.mubr.msk.f32.mxu0 %vm1303_vm5, %v1302_v54  ;;  %1149 = vmatpush3.msra.mxu0 %v363_v56 }
  0xb6   : > { %v371_v20 = vpop.permute.xlu0 %370  ;;  %v381_v22 = vpop.permute.xlu1 %380 }
  0xba   : > { %v376_v21 = vpop.permute.xlu0 %375  ;;  %v386_v30 = vpop.permute.xlu1 %385 }
 0x10c   : > { %v1129_v23 = vpop.f32.mrb[0].mxu0 }
 0x10d   : > { %v476_v24 = vadd.f32 %v1129_v23, %v376_v21  ;;  %v470_v25 = vpop.f32.mrb[1].mxu0  ;;  %v554_v23 = vld [vmem:[#allocation3] sm:$0xff] }
 0x10e   : > { %v471_v26 = vadd.f32 %v470_v25, %v371_v20 }
 0x10f   : > { %v497_v27 = vsel %vm493_vm3, %v476_v24, -inf }
 0x110   : > { %498 = vmax.xlane.f32.xlu1 %v497_v27  ;;  %v1132_v28 = vpop.f32.mrb[2].mxu0  ;;  %v494_v29 = vsel %vm493_vm3, %v471_v26, -inf }
 0x111   : > { %v480_v31 = vpop.f32.mrb[3].mxu0  ;;  %495 = vmax.xlane.f32.xlu0 %v494_v29  ;;  %v486_v33 = vadd.f32 %v1132_v28, %v386_v30  ;;  %v557_v30 = vld [vmem:[#allocation3 + $0x18] sm:$0xff] }
 0x112   : > { %v481_v32 = vadd.f32 %v480_v31, %v381_v22  ;;  %v555_v22 = vld [vmem:[#allocation3 + $0x8] sm:$0xff] }
 0x113   : > { %v503_v35 = vsel %vm493_vm3, %v486_v33, -inf }
 0x114   : > { %v500_v34 = vsel %vm493_vm3, %v481_v32, -inf }
 0x115   : > { %501 = vmax.xlane.f32.xlu0 %v500_v34 }
 0x119   : > { %504 = vmax.xlane.f32.xlu0 %v503_v35 }
 0x19d   : > { %v499_v38 = vpop.xlane.xlu1 %498 }
 0x19e   : > { %v1444_v39 = vmax.f32 %v1441_v36, %v499_v38  ;;  %v496_v40 = vpop.xlane.xlu0 %495  ;;  %v879_v38 = vld [vmem:[#allocation4] sm:$0xff] }
 0x19f   : > { %v506_v41 = vmax.f32 %v489_v37, %v496_v40 }
 0x1a0   : > { %v511_v42 = vsub.f32 %v1441_v36, %v1444_v39  ;;  %584 = vst.msk [vmem:[#allocation2 + $0x8] sm:$0xff] %vm578_vm4, %v1444_v39  ;;  %529 = vperm.xlu0 %1215, %v1444_v39  }
 0x1a1   : > { %v510_v44 = vsub.f32 %v489_v37, %v506_v41  ;;  %583 = vst.msk [vmem:[#allocation2] sm:$0xff] %vm578_vm4, %v506_v41  ;;  %524 = vperm.xlu1 %1216, %v506_v41   ;;  %v880_v41 = vld [vmem:[#allocation4 + $0x8] sm:$0xff] }
 0x1a2   : > { %v502_v45 = vpop.xlane.xlu0 %501  ;;  %v516_v19 = vmul.f32 1.442695, %v511_v42 }
 0x1a3   : > { %v514_v46 = vmul.f32 1.442695, %v510_v44  ;;  %v508_v47 = vmax.f32 %v491_v43, %v502_v45 }
 0x1a5   : > { %1217 = vpow2.f32 %v514_v46  ;;  %v512_v49 = vsub.f32 %v491_v43, %v508_v47  ;;  %585 = vst.msk [vmem:[#allocation2 + $0x10] sm:$0xff] %vm578_vm4, %v508_v47  ;;  %534 = vperm.xlu1 %1216, %v508_v47   ;;  %v881_v47 = vld [vmem:[#allocation4 + $0x10] sm:$0xff] }
 0x1a6   : > { %v505_v50 = vpop.xlane.xlu0 %504 }
 0x1a7   : > { %v509_v51 = vmax.f32 %v492_v48, %v505_v50  ;;  %v518_v10 = vmul.f32 1.442695, %v512_v49 }
 0x1a9   : > { %v513_v52 = vsub.f32 %v492_v48, %v509_v51  ;;  %586 = vst.msk [vmem:[#allocation2 + $0x18] sm:$0xff] %vm578_vm4, %v509_v51  ;;  %539 = vperm.xlu1 %1216, %v509_v51   ;;  %v882_v48 = vld [vmem:[#allocation4 + $0x18] sm:$0xff] }
 0x1ab   : > { %v520_v13 = vmul.f32 1.442695, %v513_v52 }
 0x1af   : > { %v1456_v55 = vpop.eup %1217 }
 0x1b0   : > { %885 = vperm.xlu1 %1216, %v1456_v55  }
 0x21f   : > { %v530_v57 = vpop.permute.xlu0 %529 }
 0x220   : > { %v543_v58 = vsub.f32 %v476_v24, %v530_v57  ;;  %v525_v59 = vpop.permute.xlu1 %524 }
 0x221   : > { %v542_v60 = vsub.f32 %v471_v26, %v525_v59  ;;  %v558_v26 = vmul.f32 %v1456_v55, %v554_v23 }
 0x222   : > { %v548_v61 = vmul.f32 1.442695, %v543_v58 }
 0x223   : > { %v546_v62 = vmul.f32 1.442695, %v542_v60 }
 0x224   : > { %1219 = vpow2.f32 %v548_v61  ;;  %v535_v63 = vpop.permute.xlu1 %534 }
 0x225   : > { %1221 = vpow2.f32 %v546_v62  ;;  %v544_v0 = vsub.f32 %v481_v32, %v535_v63 }
 0x227   : > { %v550_v1 = vmul.f32 1.442695, %v544_v0  ;;  %v1304_v0 = vmov (!%p1106_p13), 0  }
 0x228   : > { %v540_v2 = vpop.permute.xlu1 %539 }
 0x229   : > { %v545_v3 = vsub.f32 %v486_v33, %v540_v2  ;;  %1223 = vpow2.f32 %v550_v1  ;;  %v556_v33 = vld [vmem:[#allocation3 + $0x10] sm:$0xff] }
 0x22b   : > { %v552_v4 = vmul.f32 1.442695, %v545_v3 }
 0x22d   : > { %1225 = vpow2.f32 %v552_v4 }
 0x22e   : > { %v1220_v5 = vpop.eup %1219  ;;  %1227 = vpow2.f32 %v518_v10 }
 0x22f   : > { %v1222_v7 = vpop.eup %1221  ;;  %v565_v8 = vsel %vm493_vm3, %v1220_v5, 0.0  ;;  %1229 = vpow2.f32 %v520_v13  ;;  %v886_v21 = vpop.permute.xlu1 %885 }
 0x230   : > { %1136 = vmatmul.mubr.msk.f32.vlgmr.msra.gmra.mrb[0].mxu1 %vm493_vm3, %v1222_v7  ;;  %566 = vadd.xlane.f32.xlu1 %v565_v8  ;;  %v562_v9 = vsel %vm493_vm3, %v1222_v7, 0.0  ;;  %1231 = vpow2.f32 %v516_v19  ;;  %v903_v40 = vmul.f32 %v886_v21, %v879_v38 }
 0x231   : > { %1139 = vmatpush3.msra.mxu1 %v361_v6  ;;  %563 = vadd.xlane.f32.xlu0 %v562_v9 }
 0x232   : > { %1140 = vmatprep.mubr.msk.f32.mxu1 %vm1303_vm5, %v1302_v54  ;;  %1143 = vmatprep.subr.mxu1 %v1302_v54 }
 0x233   : > { %v1224_v12 = vpop.eup %1223 }
 0x234   : > { %1141 = vmatmul.mubr.msk.f32.vlgmr.msra.gmra.mrb[2].mxu1 %vm493_vm3, %v1220_v5  ;;  %v568_v16 = vsel %vm493_vm3, %v1224_v12, 0.0 }
 0x235   : > { %1144 = vmatpush3.msra.mxu1 %v362_v11  ;;  %1145 = vmatprep.mubr.msk.f32.mxu1 %vm1303_vm5, %v1302_v54 }
 0x237   : > { %v1226_v14 = vpop.eup %1225 }
 0x238   : > { %1146 = vmatmul.mubr.msk.f32.vlgmr.msra.gmra.mrb[4].mxu1 %vm493_vm3, %v1224_v12  ;;  %1151 = vmatmul.mubr.msk.f32.vlgmr.msra.gmra.mrb[4].mxu0 %vm493_vm3, %v1226_v14  ;;  %v571_v15 = vsel %vm493_vm3, %v1226_v14, 0.0  ;;  %v1228_v17 = vpop.eup %1227 }
 0x239   : > { %572 = vadd.xlane.f32.xlu0 %v571_v15  ;;  %v1230_v18 = vpop.eup %1229  ;;  %v560_v35 = vmul.f32 %v1228_v17, %v556_v33 }
 0x23a   : > { %v1232_v20 = vpop.eup %1231  ;;  %v561_v31 = vmul.f32 %v1230_v18, %v557_v30 }
 0x23b   : > { %v559_v24 = vmul.f32 %v1232_v20, %v555_v22 }
 0x23d   : > { %569 = vadd.xlane.f32.xlu0 %v568_v16 }
 0x241   : > { %895 = vperm.xlu1 %1216, %v1228_v17  }
 0x245   : > { %900 = vperm.xlu1 %1216, %v1230_v18  }
 0x249   : > { %1234 = vset.pattern.permute.xlu1 (!%p1106_p13), %v1304_v0 }
 0x253   : > { %890 = vperm.xlu0 %1215, %v1232_v20  }
 0x257   : > { %1233 = vset.pattern.permute.xlu0 (!%p1106_p13), %v1304_v0 }
 0x2bd   : > { %v567_v25 = vpop.xlane.xlu1 %566 }
 0x2be   : > { %v575_v27 = vadd.f32 %v567_v25, %v559_v24  ;;  %v564_v28 = vpop.xlane.xlu0 %563 }
 0x2bf   : > { %v574_v29 = vadd.f32 %v564_v28, %v558_v26 }
 0x2c0   : > { %580 = vst.msk [vmem:[#allocation3 + $0x8] sm:$0xff] %vm578_vm4, %v575_v27 }
 0x2c1   : > { %579 = vst.msk [vmem:[#allocation3] sm:$0xff] %vm578_vm4, %v574_v29  ;;  %v896_v39 = vpop.permute.xlu1 %895 }
 0x2c2   : > { %v905_v53 = vmul.f32 %v896_v39, %v881_v47 }
 0x2c5   : > { %v901_v49 = vpop.permute.xlu1 %900 }
 0x2c6   : > { %v573_v32 = vpop.xlane.xlu0 %572  ;;  %v906_v54 = vmul.f32 %v901_v49, %v882_v48 }
 0x2c7   : > { %v577_v34 = vadd.f32 %v573_v32, %v561_v31  ;;  %v920_v1 = vld [vmem:[#allocation3 + $0x8] sm:$0xff] (!%p1106_p13) }
 0x2c8   : > { %v919_v62 = vld [vmem:[#allocation3] sm:$0xff] (!%p1106_p13) }
 0x2c9   : > { %582 = vst.msk [vmem:[#allocation3 + $0x18] sm:$0xff] %vm578_vm4, %v577_v34 }
 0x2ca   : > { %v570_v36 = vpop.xlane.xlu0 %569 }
 0x2cb   : > { %v576_v37 = vadd.f32 %v570_v36, %v560_v35 }
 0x2cd   : > { %581 = vst.msk [vmem:[#allocation3 + $0x10] sm:$0xff] %vm578_vm4, %v576_v37 }
 0x2d0   : > { %v922_v63 = vld [vmem:[#allocation3 + $0x18] sm:$0xff] (!%p1106_p13) }
 0x2d2   : > { %v891_v42 = vpop.permute.xlu0 %890 }
 0x2d3   : > { %v904_v46 = vmul.f32 %v891_v42, %v880_v41 }
 0x2d4   : > { %v921_v61 = vld [vmem:[#allocation3 + $0x10] sm:$0xff] (!%p1106_p13) }
 0x2d5   : > { %1235 = vrcp.f32 (!%p1106_p13), %v921_v61 }
 0x2d6   : > { %1237 = vrcp.f32 (!%p1106_p13), %v919_v62 }
 0x2d7   : > { %1239 = vrcp.f32 (!%p1106_p13), %v922_v63 }
 0x2d8   : > { %1241 = vrcp.f32 (!%p1106_p13), %v920_v1 }
 0x2df   : > { %v1236_v2 = vpop.eup (!%p1106_p13), %1235 }
 0x2e0   : > { %v1238_v3 = vpop.eup (!%p1106_p13), %1237  ;;  %947 = vperm.xlu1 (!%p1106_p13), %1234, %v1236_v2  }
 0x2e1   : > { %v1240_v4 = vpop.eup (!%p1106_p13), %1239  ;;  %937 = vperm.xlu0 (!%p1106_p13), %1233, %v1238_v3  }
 0x2e2   : > { %v1242_v5 = vpop.eup (!%p1106_p13), %1241 }
 0x2e4   : > { %952 = vperm.xlu1 (!%p1106_p13), %1234, %v1240_v4  }
 0x2e5   : > { %942 = vperm.xlu0 (!%p1106_p13), %1233, %v1242_v5  }
 0x303   : > { %v656_v43 = vpop.f32.mrb[0].mxu1 }
 0x304   : > { %v907_v44 = vadd.f32 %v903_v40, %v656_v43  ;;  %v1137_v45 = vpop.f32.mrb[1].mxu1 }
 0x306   : > { %911 = vst.msk [vmem:[#allocation4] sm:$0xff] %vm388_vm2, %v907_v44 }
 0x307   : > { %v729_v50 = vpop.f32.mrb[2].mxu1 }
 0x308   : > { %v908_v51 = vadd.f32 %v904_v46, %v729_v50  ;;  %v1142_v52 = vpop.f32.mrb[3].mxu1  ;;  %918 = sbr.rel (%p1106_p13) target bundleno = 872 (0x368), region = 82 }
 0x30a   : > { %912 = vst.msk [vmem:[#allocation4 + $0x8] sm:$0xff] %vm388_vm2, %v908_v51 }
 0x30b   : > { %v802_v55 = vpop.f32.mrb[4].mxu1  ;;  %v875_v56 = vpop.f32.mrb[4].mxu0 }
 0x30c   : > { %v909_v57 = vadd.f32 %v905_v53, %v802_v55  ;;  %v910_v58 = vadd.f32 %v906_v54, %v875_v56  ;;  %v1147_v59 = vpop.f32.mrb[5].mxu1  ;;  %v1152_v60 = vpop.f32.mrb[5].mxu0 }
 0x30d   : > { %v931_v7 = vld [vmem:[#allocation4] sm:$0xff] (!%p1106_p13) }
 0x30e   : > { %913 = vst.msk [vmem:[#allocation4 + $0x10] sm:$0xff] %vm388_vm2, %v909_v57  ;;  %914 = vst.msk [vmem:[#allocation4 + $0x18] sm:$0xff] %vm388_vm2, %v910_v58 }
 0x311   : > { %v932_v13 = vld [vmem:[#allocation4 + $0x8] sm:$0xff] }
 0x315   : > { %v933_v6 = vld [vmem:[#allocation4 + $0x10] sm:$0xff]  ;;  %v934_v12 = vld [vmem:[#allocation4 + $0x18] sm:$0xff] }
 0x35f   : > { %v948_v8 = vpop.permute.xlu1 %947 }
 0x360   : > { %v957_v9 = vmul.f32 %v948_v8, %v933_v6  ;;  %v938_v10 = vpop.permute.xlu0 %937 }
 0x361   : > { %v955_v11 = vmul.f32 %v938_v10, %v931_v7 }
 0x362   : > { %961 = vst.msk [vmem:[%s1418_s20 + $0x10] sm:$0xff] %vm388_vm2, %v957_v9 }
 0x363   : > { %959 = vst.msk [vmem:[%s1418_s20] sm:$0xff] %vm388_vm2, %v955_v11  ;;  %v953_v14 = vpop.permute.xlu1 %952 }
 0x364   : > { %v958_v15 = vmul.f32 %v953_v14, %v934_v12  ;;  %v943_v16 = vpop.permute.xlu0 %942 }
 0x365   : > { %v956_v17 = vmul.f32 %v943_v16, %v932_v13 }
 0x366   : > { %962 = vst.msk [vmem:[%s1418_s20 + $0x18] sm:$0xff] %vm388_vm2, %v958_v15 }
 0x367   : > { %960 = vst.msk [vmem:[%s1418_s20 + $0x8] sm:$0xff] %vm388_vm2, %v956_v17 }
 0x368 PF: > { %s16_s23 = sadd.s32 1, %s1297_s23   ;;  %s1523_s18 = smov %s1277_s19 }
 0x369   : > { %p13_p0 = scmp.ge.s32.totalorder %s16_s23, 6   ;;  %s1524_s19 = smov %s1386_s30 }
 0x36a   : > { %s1525_s0 = smov %s1289_s21  ;;  %s1526_s20 = smov %s1293_s22 }
 0x36b   : > { %s1527_s21 = smov %s1530_s24  ;;  %s1528_s22 = smov %s1534_s25 }
 0x36c   :  { %15 = sbr.rel (!%p13_p0) target bundleno = 6 (0x6), region = 126 }

</bundles_post_ra>
